<compile_context>
chip_gen: v7x
topology: tpu7x:2x2x1
jax: 0.10.0
libtpu: 0.0.40
codegen_flags: <defaults>
</compile_context>

<pallas_src>
import math

import jax
import jax.numpy as jnp
from jax.experimental import pallas as pl
from jax.experimental.pallas import tpu as pltpu


_LANE = 128
_MAX_TILE_ROWS = 1024     # row-tile cap so huge B*C still fits VMEM


def _vmem_budgets():
    """(work budget for blocks + temps, scoped VMEM limit) in bytes, per chip."""
    cap = 64 << 20
    try:
        cap = int(getattr(pltpu.get_tpu_info(), "vmem_capacity_bytes", cap))
    except Exception:
        pass
    if cap >= (128 << 20):          # v5e / v6e: 128 MiB VMEM per TensorCore
        return 80 << 20, 96 << 20
    return 36 << 20, 48 << 20       # v7x: 64 MiB per TensorCore, keep headroom


def _sublane_fold(rows, n):
    """Spatial factor folded into rows so rows become a multiple of 8."""
    if rows % 8 == 0:
        return 1
    s = 8 // math.gcd(rows, 8)
    return s if (s > 1 and n % s == 0) else 1


def _pick_tile_n(tile_rows, n, itemsize_pred, itemsize_ref, budget):
    """Largest lane tile (128-multiple, or the full extent) fitting the budget."""
    # 2x double-buffered input blocks + ~6 f32 temporaries of block shape.
    per_elem = 2 * (itemsize_pred + itemsize_ref) + 6 * 4
    max_elems = max(_LANE * tile_rows, budget // per_elem)
    tile_n = (max_elems // tile_rows) // _LANE * _LANE
    tile_n = max(_LANE, tile_n)
    # Whole (padded) extent fits: use a single full-extent block (no masking,
    # Mosaic handles the non-aligned trailing lanes of a full-dim block).
    return n if tile_n >= n else tile_n


def _make_kernel(n, tile_n, need_mask):
    def kernel(pred_ref, ref_ref, numer_ref, denom_ref, num_acc, den_acc):
        k = pl.program_id(1)
        nk = pl.num_programs(1)

        @pl.when(k == 0)
        def _():
            num_acc[...] = jnp.zeros_like(num_acc)
            den_acc[...] = jnp.zeros_like(den_acc)

        pred_blk = pred_ref[...].astype(jnp.float32)    # (tile_rows, tile_n)
        ref_blk = ref_ref[...].astype(jnp.float32)

        logp = jnp.log(pred_blk)
        # pred.log().masked_fill_(~isfinite, 0): keep only finite log values.
        logp = jnp.where(jnp.abs(logp) < jnp.inf, logp, 0.0)
        contrib = logp * ref_blk

        def accumulate(c, r):
            num_acc[...] += jnp.sum(c, axis=-1, keepdims=True)
            den_acc[...] += jnp.sum(r, axis=-1, keepdims=True)

        if need_mask:
            is_tail = k == nk - 1

            @pl.when(jnp.logical_not(is_tail))
            def _():
                accumulate(contrib, ref_blk)

            @pl.when(is_tail)
            def _():
                # Mask only the ragged tail block; garbage lanes were computed
                # above and are neutralized here (select-after-garbage order).
                lane = jax.lax.broadcasted_iota(jnp.int32, contrib.shape, 1)
                valid = lane < (n - k * tile_n)
                accumulate(jnp.where(valid, contrib, 0.0),
                           jnp.where(valid, ref_blk, 0.0))
        else:
            accumulate(contrib, ref_blk)

        @pl.when(k == nk - 1)
        def _():
            numer_ref[...] = num_acc[...]
            denom_ref[...] = den_acc[...]

    return kernel


def cat_loss(pred, ref, reduction="mean", tile_n=None, tile_rows=None):
    """CatLoss.forward for floating-point ref, weighted=False, no mask/activation."""
    # TODO(synk): integer-label references (forward_labels), `weighted`, `mask`
    # and `activation` options of CatLoss are not implemented in this kernel.
    if ref.shape[1] != pred.shape[1]:
        raise ValueError(
            f"Number of classes not consistent. Expected {pred.shape[1]} "
            f"but got {ref.shape[1]}."
        )
    B, C = pred.shape[:2]
    N = int(math.prod(pred.shape[2:]))
    R = B * C
    if N >= 2 ** 31:
        raise ValueError("Spatial size too large for int32 in-kernel indexing.")

    # Fold a spatial factor into rows so rows are sublane-dense (multiple of 8).
    s = _sublane_fold(R, N)
    Rf, Nf = R * s, N // s

    # Metadata-only reshapes, no extra HBM pass, no dtype cast on the host.
    pred2 = pred.reshape(Rf, Nf)
    ref2 = ref.reshape(Rf, Nf)

    budget, vmem_limit = _vmem_budgets()

    # Row tiling: full extent when it fits, otherwise 8-aligned tiles.
    if tile_rows is None:
        tile_rows = Rf if Rf <= _MAX_TILE_ROWS else _MAX_TILE_ROWS
    tile_rows = min(tile_rows, Rf)
    if tile_rows != Rf and tile_rows % 8 != 0:
        raise ValueError("tile_rows must be a multiple of 8 or the full row count")
    n_row_tiles = pl.cdiv(Rf, tile_rows)

    if tile_n is None:
        tile_n = _pick_tile_n(tile_rows, Nf, pred2.dtype.itemsize,
                              ref2.dtype.itemsize, budget)
    tile_n = min(tile_n, Nf)
    if tile_n != Nf and tile_n % _LANE != 0:
        raise ValueError("tile_n must be a multiple of 128 or the full extent")
    n_tiles = pl.cdiv(Nf, tile_n)
    need_mask = (n_tiles > 1) and (Nf % tile_n != 0)

    kernel = _make_kernel(Nf, tile_n, need_mask)

    numer_flat, denom_flat = pl.pallas_call(
        kernel,
        out_shape=(
            jax.ShapeDtypeStruct((Rf, 1), jnp.float32),
            jax.ShapeDtypeStruct((Rf, 1), jnp.float32),
        ),
        grid_spec=pltpu.PrefetchScalarGridSpec(
            num_scalar_prefetch=0,
            grid=(n_row_tiles, n_tiles),          # reduction axis last
            in_specs=[
                pl.BlockSpec((tile_rows, tile_n), lambda r, k: (r, k)),
                pl.BlockSpec((tile_rows, tile_n), lambda r, k: (r, k)),
            ],
            out_specs=[
                pl.BlockSpec((tile_rows, 1), lambda r, k: (r, 0)),
                pl.BlockSpec((tile_rows, 1), lambda r, k: (r, 0)),
            ],
            scratch_shapes=[
                pltpu.VMEM((tile_rows, 1), jnp.float32),
                pltpu.VMEM((tile_rows, 1), jnp.float32),
            ],
        ),
        compiler_params=pltpu.CompilerParams(
            dimension_semantics=("parallel", "arbitrary"),
            vmem_limit_bytes=vmem_limit,
        ),
        cost_estimate=pl.CostEstimate(
            flops=6 * Rf * Nf,
            transcendentals=Rf * Nf,
            bytes_accessed=pred2.nbytes + ref2.nbytes + 2 * Rf * 4,
        ),
    )(pred2, ref2)

    # Glue (tiny): undo the sublane fold, normalize, average, negate.
    numer = numer_flat[:, 0].reshape(R, s).sum(axis=-1).reshape(B, C)
    denom = denom_flat[:, 0].reshape(R, s).sum(axis=-1).reshape(B, C)

    loss = numer / denom            # (B, C) -- 0/0 = NaN, as in the reference
    loss = loss.mean(axis=-1)       # (B,)   -- weighted=False branch
    loss = -loss                    # loss.neg_() happens before reduce()

    if not reduction:
        return loss
    if isinstance(reduction, str):
        r = reduction.lower()
        if r == "mean":
            return loss.mean()
        if r == "sum":
            return loss.sum()
        raise ValueError(f'Unknown reduction "{reduction}"')
    if callable(reduction):
        return reduction(loss)
    raise ValueError(f"Don't know what to do with reduction: {reduction}")


def _ref_cat_loss(pred, ref):
    """Pure-JAX reference of the same CatLoss semantics (for checking)."""
    B, C = pred.shape[:2]
    logp = jnp.log(pred)
    logp = jnp.where(jnp.isfinite(logp), logp, 0.0)
    p2 = logp.reshape(B, C, -1).astype(jnp.float32)
    r2 = ref.reshape(B, C, -1).astype(jnp.float32)
    numer = (p2 * r2).sum(-1)
    denom = r2.sum(-1)
    return (-(numer / denom).mean(-1)).mean()


def _make_inputs(kp, kl, B, C, H, W):
    pred = jax.nn.softmax(jax.random.normal(kp, (B, C, H, W), jnp.float32), axis=1)
    labels = jax.random.randint(kl, (B, H, W), 0, C)
    ref = jax.nn.one_hot(labels, C, dtype=jnp.float32).transpose(0, 3, 1, 2)
    return pred, ref


if __name__ == "__main__":
    key = jax.random.PRNGKey(0)
    k1, k2, k3, k4, k5, k6 = jax.random.split(key, 6)

    # 1) Default path: R = 8 (already sublane-dense), single full-extent
    #    spatial block, no masking.
    pred, ref = _make_inputs(k1, k2, 2, 4, 16, 16)
    out = jax.block_until_ready(cat_loss(pred, ref, reduction="mean"))
    expect = _ref_cat_loss(pred, ref)
    assert jnp.allclose(out, expect, rtol=1e-5, atol=1e-6), (out, expect)

    # 2) Odd spatial size + forced small tile: multi-step spatial reduction
    #    with pl.when-gated ragged-tail masking and scratch accumulation.
    pred_b, ref_b = _make_inputs(k3, k4, 2, 4, 15, 15)
    out_b = jax.block_until_ready(cat_loss(pred_b, ref_b, reduction="mean", tile_n=128))
    expect_b = _ref_cat_loss(pred_b, ref_b)
    assert jnp.allclose(out_b, expect_b, rtol=1e-5, atol=1e-6), (out_b, expect_b)

    # 3) R = 6 (not a multiple of 8): exercises the sublane fold (s=4 ->
    #    24 dense rows) and, with tile_rows=8, the "parallel" row grid axis.
    pred_c, ref_c = _make_inputs(k5, k6, 2, 3, 16, 16)
    out_c = jax.block_until_ready(cat_loss(pred_c, ref_c, reduction="mean", tile_rows=8))
    expect_c = _ref_cat_loss(pred_c, ref_c)
    assert jnp.allclose(out_c, expect_c, rtol=1e-5, atol=1e-6), (out_c, expect_c)

    print("KERNEL_OK")
</pallas_src>

<mosaic_0001>
module attributes {stable_mosaic.version = 11 : i64} {
  func.func @kernel(%arg0: i32, %arg1: i32, %arg2: memref<8x256xf32, #tpu.memory_space<vmem>>, %arg3: memref<8x256xf32, #tpu.memory_space<vmem>>, %arg4: memref<8x1xf32, #tpu.memory_space<vmem>>, %arg5: memref<8x1xf32, #tpu.memory_space<vmem>>, %arg6: memref<8x1xf32, #tpu.memory_space<vmem>>, %arg7: memref<8x1xf32, #tpu.memory_space<vmem>>) attributes {dimension_semantics = [#tpu.dimension_semantics<parallel>, #tpu.dimension_semantics<arbitrary>], iteration_bounds = array<i64: 1, 1>, scalar_prefetch = 0 : i64, scratch_operands = 2 : i64, tpu.core_type = #tpu.core_type<tc>, window_params = [{transform_indices = @transform_0, window_bounds = array<i64: 8, 256>}, {transform_indices = @transform_1, window_bounds = array<i64: 8, 256>}, {transform_indices = @transform_2, window_bounds = array<i64: 8, 1>}, {transform_indices = @transform_3, window_bounds = array<i64: 8, 1>}]} {
    %c0_i32 = arith.constant 0 : i32
    %0 = arith.cmpi eq, %arg1, %c0_i32 : i32
    %1 = arith.extui %0 : i1 to i32
    %c0_i32_0 = arith.constant 0 : i32
    %2 = arith.cmpi ne, %1, %c0_i32_0 : i32
    scf.if %2 {
      %cst_17 = arith.constant 0.000000e+00 : f32
      %25 = vector.broadcast %cst_17 : f32 to vector<8x1xf32>
      %c0_18 = arith.constant 0 : index
      %c0_19 = arith.constant 0 : index
      %26 = vector.load %arg6[%c0_18, %c0_19] : memref<8x1xf32, #tpu.memory_space<vmem>>, vector<8x1xf32>
      tpu.vector_store %arg6[%c0_18, %c0_19], %25 {strides = array<i32>} : memref<8x1xf32, #tpu.memory_space<vmem>>, vector<8x1xf32>,
      %cst_20 = arith.constant 0.000000e+00 : f32
      %27 = vector.broadcast %cst_20 : f32 to vector<8x1xf32>
      %c0_21 = arith.constant 0 : index
      %c0_22 = arith.constant 0 : index
      %28 = vector.load %arg7[%c0_21, %c0_22] : memref<8x1xf32, #tpu.memory_space<vmem>>, vector<8x1xf32>
      tpu.vector_store %arg7[%c0_21, %c0_22], %27 {strides = array<i32>} : memref<8x1xf32, #tpu.memory_space<vmem>>, vector<8x1xf32>,
    } else {
    }
    %c0 = arith.constant 0 : index
    %c0_1 = arith.constant 0 : index
    %3 = vector.load %arg2[%c0, %c0_1] : memref<8x256xf32, #tpu.memory_space<vmem>>, vector<8x256xf32>
    %c0_2 = arith.constant 0 : index
    %c0_3 = arith.constant 0 : index
    %4 = vector.load %arg3[%c0_2, %c0_3] : memref<8x256xf32, #tpu.memory_space<vmem>>, vector<8x256xf32>
    %5 = math.log %3 : vector<8x256xf32>
    %6 = math.absf %5 : vector<8x256xf32>
    %cst = arith.constant 0x7F800000 : f32
    %7 = vector.broadcast %cst : f32 to vector<8x256xf32>
    %8 = arith.cmpf olt, %6, %7 : vector<8x256xf32>
    %cst_4 = arith.constant 0.000000e+00 : f32
    %9 = vector.broadcast %cst_4 : f32 to vector<8x256xf32>
    %10 = arith.select %8, %5, %9 : vector<8x256xi1>, vector<8x256xf32>
    %11 = arith.mulf %10, %4 : vector<8x256xf32>
    %c0_5 = arith.constant 0 : index
    %c0_6 = arith.constant 0 : index
    %12 = vector.load %arg6[%c0_5, %c0_6] : memref<8x1xf32, #tpu.memory_space<vmem>>, vector<8x1xf32>
    %cst_7 = arith.constant dense<0.000000e+00> : vector<8xf32>
    %13 = vector.multi_reduction <add>, %11, %cst_7 [1] : vector<8x256xf32> to vector<8xf32>
    %14 = vector.shape_cast %13 : vector<8xf32> to vector<8x1xf32>
    %15 = arith.addf %12, %14 : vector<8x1xf32>
    %c0_8 = arith.constant 0 : index
    %c0_9 = arith.constant 0 : index
    %16 = vector.load %arg6[%c0_8, %c0_9] : memref<8x1xf32, #tpu.memory_space<vmem>>, vector<8x1xf32>
    tpu.vector_store %arg6[%c0_8, %c0_9], %15 {strides = array<i32>} : memref<8x1xf32, #tpu.memory_space<vmem>>, vector<8x1xf32>,
    %c0_10 = arith.constant 0 : index
    %c0_11 = arith.constant 0 : index
    %17 = vector.load %arg7[%c0_10, %c0_11] : memref<8x1xf32, #tpu.memory_space<vmem>>, vector<8x1xf32>
    %cst_12 = arith.constant dense<0.000000e+00> : vector<8xf32>
    %18 = vector.multi_reduction <add>, %4, %cst_12 [1] : vector<8x256xf32> to vector<8xf32>
    %19 = vector.shape_cast %18 : vector<8xf32> to vector<8x1xf32>
    %20 = arith.addf %17, %19 : vector<8x1xf32>
    %c0_13 = arith.constant 0 : index
    %c0_14 = arith.constant 0 : index
    %21 = vector.load %arg7[%c0_13, %c0_14] : memref<8x1xf32, #tpu.memory_space<vmem>>, vector<8x1xf32>
    tpu.vector_store %arg7[%c0_13, %c0_14], %20 {strides = array<i32>} : memref<8x1xf32, #tpu.memory_space<vmem>>, vector<8x1xf32>,
    %c0_i32_15 = arith.constant 0 : i32
    %22 = arith.cmpi eq, %arg1, %c0_i32_15 : i32
    %23 = arith.extui %22 : i1 to i32
    %c0_i32_16 = arith.constant 0 : i32
    %24 = arith.cmpi ne, %23, %c0_i32_16 : i32
    scf.if %24 {
      %c0_17 = arith.constant 0 : index
      %c0_18 = arith.constant 0 : index
      %25 = vector.load %arg6[%c0_17, %c0_18] : memref<8x1xf32, #tpu.memory_space<vmem>>, vector<8x1xf32>
      %c0_19 = arith.constant 0 : index
      %c0_20 = arith.constant 0 : index
      %26 = vector.load %arg4[%c0_19, %c0_20] : memref<8x1xf32, #tpu.memory_space<vmem>>, vector<8x1xf32>
      tpu.vector_store %arg4[%c0_19, %c0_20], %25 {strides = array<i32>} : memref<8x1xf32, #tpu.memory_space<vmem>>, vector<8x1xf32>,
      %c0_21 = arith.constant 0 : index
      %c0_22 = arith.constant 0 : index
      %27 = vector.load %arg7[%c0_21, %c0_22] : memref<8x1xf32, #tpu.memory_space<vmem>>, vector<8x1xf32>
      %c0_23 = arith.constant 0 : index
      %c0_24 = arith.constant 0 : index
      %28 = vector.load %arg5[%c0_23, %c0_24] : memref<8x1xf32, #tpu.memory_space<vmem>>, vector<8x1xf32>
      tpu.vector_store %arg5[%c0_23, %c0_24], %27 {strides = array<i32>} : memref<8x1xf32, #tpu.memory_space<vmem>>, vector<8x1xf32>,
    } else {
    }
    return
  }
  func.func @transform_0(%arg0: i32, %arg1: i32) -> (i32, i32) {
    %c0_i32 = arith.constant 0 : i32
    return %arg0, %arg1 : i32, i32
  }
  func.func @transform_1(%arg0: i32, %arg1: i32) -> (i32, i32) {
    %c0_i32 = arith.constant 0 : i32
    return %arg0, %arg1 : i32, i32
  }
  func.func @transform_2(%arg0: i32, %arg1: i32) -> (i32, i32) {
    %c0_i32 = arith.constant 0 : i32
    %c0_i32_0 = arith.constant 0 : i32
    return %arg0, %c0_i32 : i32, i32
  }
  func.func @transform_3(%arg0: i32, %arg1: i32) -> (i32, i32) {
    %c0_i32 = arith.constant 0 : i32
    %c0_i32_0 = arith.constant 0 : i32
    return %arg0, %c0_i32 : i32, i32
  }
}

</mosaic_0001>

<bundles_post_ra>
// kernel: tpu_custom_call.1
= control target key start
LH: loop header
LB: loop body
LE: loop exit
PB: predicated region body
PF: predicated region fallthrough
CT: control target
= control target key end

     0   :  { %9 = vsyncpa [#allocation5], 0  ;;  %s204_s0 = inlined_call_operand.hbm [shape: f32[8,256], index: 0, kind: input, shape index: {}]   ;;  %s205_s1 = inlined_call_operand.hbm [shape: f32[8,256], index: 1, kind: input, shape index: {}]   ;;  %s206_s2 = inlined_call_operand.vmem [shape: f32[8,1], index: 2, kind: output, shape index: {0}]   ;;  %s207_s3 = inlined_call_operand.vmem [shape: f32[8,1], index: 3, kind: output, shape index: {1}]  }
   0x1   :  { %10 = vsyncpa [#allocation7], 0  ;;  %s145_s12 = smov [#allocation4]   ;;  %s146_s14 = smov [#allocation6]  }
   0x2   :  { %s17_s13 = sshll.u32 %s145_s12, 4  ;;  %s27_s15 = sshll.u32 %s146_s14, 4  ;;  %s18_s13 = int_to_ptr.vmem [resolvable:$true] %s17_s13  ;;  %s28_s15 = int_to_ptr.vmem [resolvable:$true] %s27_s15 }
   0x3   :  { %s97_s18 = scalar_lea.hbm %s204_s0, 256 }
   0x4   :  { %p98_p0 = scmp.ne.s32.totalorder %s204_s0, %s97_s18  ;;  %p101_p1 = scmp.lt.u32.totalorder %s97_s18, %s204_s0 }
   0x6   :  { %p103_p2 = pnand %p101_p1, %p98_p0 }
   0x8   :  { %106 = shalt.err (!%p103_p2)
}
   0x9   :  { %s107_s23 = scalar_lea.vmem %s18_s13, 256  ;;  %p112_p4 = scmp.lt.s32.totalorder %s18_s13, %s18_s13 }
   0xa   :  { %p108_p3 = scmp.ne.s32.totalorder %s18_s13, %s107_s23  ;;  %p113_p5 = scmp.lt.s32.totalorder %s107_s23, %s107_s23 }
   0xc   :  { %p114_p6 = por %p113_p5, %p112_p4 }
   0xe   :  { %p115_p7 = pnand %p114_p6, %p108_p3 }
  0x10   :  { %118 = shalt.err (!%p115_p7)
}
  0x11   :  { %20 = dma.hbm_to_vmem [thread:$0]  %s204_s0, 256, %s18_s13, [#allocation5]  }
  0x12   :  { %s119_s28 = scalar_lea.hbm %s205_s1, 256 }
  0x13   :  { %p120_p8 = scmp.ne.s32.totalorder %s205_s1, %s119_s28  ;;  %p123_p9 = scmp.lt.u32.totalorder %s119_s28, %s205_s1 }
  0x15   :  { %p125_p10 = pnand %p123_p9, %p120_p8 }
  0x17   :  { %128 = shalt.err (!%p125_p10)
}
  0x18   :  { %s129_s6 = scalar_lea.vmem %s28_s15, 256  ;;  %p134_p12 = scmp.lt.s32.totalorder %s28_s15, %s28_s15 }
  0x19   :  { %p130_p11 = scmp.ne.s32.totalorder %s28_s15, %s129_s6  ;;  %p135_p13 = scmp.lt.s32.totalorder %s129_s6, %s129_s6 }
  0x1b   :  { %p136_p0 = por %p135_p13, %p134_p12 }
  0x1d   :  { %p137_p1 = pnand %p136_p0, %p130_p11 }
  0x1f   :  { %140 = shalt.err (!%p137_p1)
}
  0x20   :  { %30 = dma.hbm_to_vmem [thread:$0]  %s205_s1, 256, %s28_s15, [#allocation7]  }
  0x21   :  { %141 = dma.done.wait [#allocation5], 256  }
  0x22   :  { %142 = vsyncadd [#allocation5], 4294967040 }
  0x23   :  { %143 = dma.done.wait [#allocation7], 256  }
  0x24   :  { %144 = vsyncadd [#allocation7], 4294967040  ;;  %vm41_vm0 = vcmask 7168   ;;  %v147_v0 = vmov 0.0   ;;  %v44_v1 = vld [vmem:[#allocation4] sm:$0xff]  ;;  %v45_v2 = vld [vmem:[#allocation4 + $0x8] sm:$0xff] }
  0x25   :  { %42 = vst.msk [vmem:[#allocation2] sm:$0xff] %vm41_vm0, %v147_v0  ;;  %43 = vst.msk [vmem:[#allocation3] sm:$0xff] %vm41_vm0, %v147_v0  ;;  %93 = vlog2.f32 %v44_v1  ;;  %v46_v8 = vld [vmem:[#allocation6] sm:$0xff]  ;;  %v47_v10 = vld [vmem:[#allocation6 + $0x8] sm:$0xff] }
  0x26   :  { %95 = vlog2.f32 %v45_v2  ;;  %v68_v16 = vadd.f32 %v47_v10, %v46_v8 }
  0x2c   :  { %v60_v17 = vld [vmem:[#allocation2] sm:$0xff]  ;;  %v67_v20 = vld [vmem:[#allocation3] sm:$0xff] }
  0x2f   :  { %v94_v3 = vpop.eup %93 }
  0x30   :  { %v96_v4 = vpop.eup %95  ;;  %v49_v5 = vmul.f32 0.6931472, %v94_v3 }
  0x31   :  { %v51_v6 = vmul.f32 0.6931472, %v96_v4 }
  0x32   :  { %v52_v7 = vand.u32 2147483647, %v49_v5 }
  0x33   :  { %v53_v9 = vand.u32 2147483647, %v51_v6 }
  0x34   :  { %vm54_vm1 = vcmp.lt.f32.partialorder %v52_v7, inf }
  0x35   :  { %vm55_vm2 = vcmp.lt.f32.partialorder %v53_v9, inf  ;;  %v56_v11 = vsel %vm54_vm1, %v49_v5, 0.0 }
  0x36   :  { %v57_v12 = vsel %vm55_vm2, %v51_v6, 0.0  ;;  %v58_v13 = vmul.f32 %v56_v11, %v46_v8 }
  0x37   :  { %v59_v14 = vmul.f32 %v57_v12, %v47_v10 }
  0x39   :  { %v61_v15 = vadd.f32 %v59_v14, %v58_v13 }
  0x3b   :  { %62 = vadd.xlane.f32.xlu0 %v61_v15 }
  0x3f   :  { %69 = vadd.xlane.f32.xlu0 %v68_v16 }
  0xc8   :  { %v63_v18 = vpop.xlane.xlu0 %62 }
  0xc9   :  { %v64_v19 = vadd.f32 %v63_v18, %v60_v17 }
  0xcb   :  { %66 = vst.msk [vmem:[#allocation2] sm:$0xff] %vm41_vm0, %v64_v19 }
  0xcc   :  { %v70_v21 = vpop.xlane.xlu0 %69 }
  0xcd   :  { %v71_v22 = vadd.f32 %v70_v21, %v67_v20 }
  0xcf   :  { %72 = vst.msk [vmem:[#allocation3] sm:$0xff] %vm41_vm0, %v71_v22 }
  0xd2   :  { %v76_v23 = vld [vmem:[#allocation2] sm:$0xff] }
  0xd3   :  { %77 = vst.msk [vmem:[%s206_s2] sm:$0xff] %vm41_vm0, %v76_v23 }
  0xd6   :  { %v78_v24 = vld [vmem:[#allocation3] sm:$0xff] }
  0xd7   :  { %79 = vst.msk [vmem:[%s207_s3] sm:$0xff] %vm41_vm0, %v78_v24 }
  0xd8   :  { %88 = vsyncpa [#allocation5], 1 }
  0xd9   :  { %89 = vsyncpa [#allocation7], 1 }

</bundles_post_ra>
